<compile_context>
chip_gen: v5e
topology: v5e:2x2
jax: 0.10.0
libtpu: 0.0.40
codegen_flags: <defaults>
</compile_context>

<pallas_src>
import functools

import jax
import jax.numpy as jnp
from jax.experimental import pallas as pl
from jax.experimental.pallas import tpu as pltpu


def _gn_kernel(x_ref, w_ref, b_ref, o_ref, *, eps, cg, hw):
    """One block = Bg whole (batch, group) rows.

    x_ref / o_ref: (Bg, Cg*HW)   lane-dense slab, Bg whole groups
    w_ref / b_ref: (Bg, Cg)      per-channel affine for exactly these groups
    """
    inv_n = 1.0 / float(cg * hw)

    # Pass 1: per-group mean (lane reduction per row), f32 accumulation.
    x = x_ref[...].astype(jnp.float32)                      # (Bg, Cg*HW)
    mean = jnp.sum(x, axis=1, keepdims=True) * inv_n        # (Bg, 1)

    # Pass 2: two-pass variance (matches nn.GroupNorm numerics; avoids
    # E[x^2]-E[x]^2 cancellation).  Re-read x_ref so no block-sized f32
    # temporary has to stay live across phases (bf16 inputs / v7x VMEM).
    d = x_ref[...].astype(jnp.float32) - mean               # (Bg, Cg*HW)
    var = jnp.sum(d * d, axis=1, keepdims=True) * inv_n     # (Bg, 1), biased
    rstd = jax.lax.rsqrt(var + eps)                         # (Bg, 1)

    # Fused per-channel scale/shift: out = x*(w*rstd) + (b - mean*w*rstd).
    w = w_ref[...].astype(jnp.float32)                      # (Bg, Cg)
    b = b_ref[...].astype(jnp.float32)                      # (Bg, Cg)
    scale = w * rstd                                        # (Bg, Cg)
    shift = b - mean * scale                                # (Bg, Cg)

    # Pass 3: normalize one channel-within-group at a time.  Each slice is a
    # full-lane-width (Bg, HW) slab; all broadcasts are per-row (VPU-friendly).
    # Cg is small for GroupNorm (FCOS uses C/32, typically 8), so this unrolled
    # loop stays tiny.
    for c in range(cg):
        xc = x_ref[:, pl.ds(c * hw, hw)].astype(jnp.float32)
        o_ref[:, pl.ds(c * hw, hw)] = (
            xc * scale[:, c:c + 1] + shift[:, c:c + 1]
        ).astype(o_ref.dtype)


def _default_target_block_bytes():
    """~2 MiB blocks already sit at ~85% of HBM roofline; use 4 MiB only where
    VMEM is plentiful (v5e/v6e: 128 MiB).  v7x (64 MiB) / unknown -> 2 MiB."""
    try:
        vmem = pltpu.get_tpu_info().vmem_capacity_bytes
    except Exception:
        return 2 << 20
    return (4 << 20) if vmem >= (96 << 20) else (2 << 20)


def _pick_groups_per_block(ng, per_group_bytes, target_bytes, max_bytes):
    """Pick Bg = rows (whole groups) per block for the (N*G, Cg*HW) layout."""
    divisors = [d for d in range(1, ng + 1) if ng % d == 0]
    # Sublane alignment of the (Bg, Cg*HW) block: Bg % 8 == 0 or Bg == N*G.
    aligned = [d for d in divisors if d % 8 == 0 or d == ng]
    fit = [d for d in aligned if d * per_group_bytes <= target_bytes]
    multi_step = [d for d in fit if ng // d >= 2]
    if multi_step:
        # Biggest block that still leaves >= 2 grid steps (pipelining + the
        # v7x megacore split of the single parallel axis).
        return max(multi_step)
    if fit:
        return max(fit)
    # Even the smallest aligned row-block exceeds the target: take the smallest
    # aligned block that still fits the hard VMEM cap (more, smaller steps).
    grow = [d for d in aligned if d * per_group_bytes <= max_bytes]
    if grow:
        return min(grow)
    # TODO(synk): spatial-split path (inner "arbitrary" H*W grid axis with
    # sum/sumsq accumulation + a second normalize sweep) for feature maps whose
    # single group exceeds the VMEM budget.  Standard FCOS GN shapes never hit
    # this (largest P3 group ~0.5 MiB f32).
    raise NotImplementedError(
        "GroupNorm Pallas kernel: a single aligned group block "
        f"({min(aligned) * per_group_bytes} bytes) exceeds the VMEM budget "
        f"({max_bytes} bytes); spatial splitting is not implemented."
    )


def group_norm(x, weight, bias, num_groups, eps=1e-5, *,
               target_block_bytes=None, max_block_bytes=6 << 20):
    """GroupNorm forward. x: (N, C, H, W); weight, bias: (C,)."""
    N, C, H, W = x.shape
    G = num_groups
    assert C % G == 0, "channels must divide evenly into groups"
    Cg = C // G
    HW = H * W
    NG = N * G
    itemsize = jnp.dtype(x.dtype).itemsize

    if target_block_bytes is None:
        target_block_bytes = _default_target_block_bytes()

    per_group_bytes = Cg * HW * itemsize
    Bg = _pick_groups_per_block(NG, per_group_bytes, target_block_bytes,
                                max_block_bytes)
    grid = (NG // Bg,)

    # Free reshape of contiguous NCHW data: one lane-dense row per (n, g) slab.
    x2 = x.reshape(NG, Cg * HW)
    # Per-(n, g)-row affine params, 2-D lane-dense (N*C elements -> negligible).
    w2 = jnp.broadcast_to(weight.reshape(1, G, Cg), (N, G, Cg)).reshape(NG, Cg)
    b2 = jnp.broadcast_to(bias.reshape(1, G, Cg), (N, G, Cg)).reshape(NG, Cg)

    kernel = functools.partial(_gn_kernel, eps=float(eps), cg=Cg, hw=HW)

    out = pl.pallas_call(
        kernel,
        out_shape=jax.ShapeDtypeStruct((NG, Cg * HW), x.dtype),
        grid_spec=pltpu.PrefetchScalarGridSpec(
            num_scalar_prefetch=0,
            grid=grid,
            in_specs=[
                pl.BlockSpec((Bg, Cg * HW), lambda i: (i, 0)),   # x rows
                pl.BlockSpec((Bg, Cg), lambda i: (i, 0)),        # weight rows
                pl.BlockSpec((Bg, Cg), lambda i: (i, 0)),        # bias rows
            ],
            out_specs=pl.BlockSpec((Bg, Cg * HW), lambda i: (i, 0)),
        ),
        compiler_params=pltpu.CompilerParams(
            dimension_semantics=("parallel",),
            # Double-buffered in+out blocks plus f32 temporaries fit with room
            # to spare on every generation (v5e/v6e 128 MiB, v7x 64 MiB).
            vmem_limit_bytes=48 << 20,
        ),
        cost_estimate=pl.CostEstimate(
            flops=6 * N * C * HW,
            transcendentals=NG,
            bytes_accessed=(2 * N * C * HW * itemsize
                            + 2 * N * C * jnp.dtype(weight.dtype).itemsize),
        ),
    )(x2, w2, b2)
    return out.reshape(N, C, H, W)


def group_norm_ref(x, weight, bias, num_groups, eps=1e-5):
    """Pure-JAX reference (matches nn.GroupNorm) for verification."""
    N, C, H, W = x.shape
    Cg = C // num_groups
    xg = x.reshape(N, num_groups, Cg * H * W).astype(jnp.float32)
    mean = jnp.mean(xg, axis=-1, keepdims=True)
    var = jnp.mean((xg - mean) ** 2, axis=-1, keepdims=True)
    xn = ((xg - mean) * jax.lax.rsqrt(var + eps)).reshape(N, C, H, W)
    return (xn * weight.reshape(1, C, 1, 1) + bias.reshape(1, C, 1, 1)).astype(x.dtype)


def _run_case(key, N, C, H, W, groups):
    x = jax.random.normal(key, (N, C, H, W), dtype=jnp.float32)
    # Non-trivial affine params so the affine path is exercised.
    weight = 1.0 + 0.1 * jnp.arange(C, dtype=jnp.float32)
    bias = 0.05 * jnp.arange(C, dtype=jnp.float32) - 0.1

    out = group_norm(x, weight, bias, groups, eps=1e-5)
    out = jax.block_until_ready(out)

    ref = group_norm_ref(x, weight, bias, groups, eps=1e-5)
    assert out.shape == (N, C, H, W)
    assert jnp.allclose(out, ref, atol=1e-4, rtol=1e-4), \
        f"mismatch vs reference for shape {(N, C, H, W)}, groups={groups}"


if __name__ == "__main__":
    key = jax.random.PRNGKey(0)
    k1, k2 = jax.random.split(key)

    # Module-consistent small shape: batch=2, out_channels=8, groups=2, 16x16.
    _run_case(k1, N=2, C=8, H=16, W=16, groups=2)

    # Larger case exercising the multi-step grid (NG=32 -> Bg=16, 2 blocks)
    # and per-block weight/bias DMAs.
    _run_case(k2, N=2, C=64, H=16, W=16, groups=16)

    print("KERNEL_OK")
</pallas_src>

<mosaic_0001>
module attributes {stable_mosaic.version = 11 : i64} {
  func.func @_gn_kernel(%arg0: i32, %arg1: memref<4x1024xf32, #tpu.memory_space<vmem>>, %arg2: memref<4x4xf32, #tpu.memory_space<vmem>>, %arg3: memref<4x4xf32, #tpu.memory_space<vmem>>, %arg4: memref<4x1024xf32, #tpu.memory_space<vmem>>) attributes {dimension_semantics = [#tpu.dimension_semantics<parallel>], iteration_bounds = array<i64: 1>, scalar_prefetch = 0 : i64, scratch_operands = 0 : i64, tpu.core_type = #tpu.core_type<tc>, window_params = [{transform_indices = @transform_0, window_bounds = array<i64: 4, 1024>}, {transform_indices = @transform_1, window_bounds = array<i64: 4, 4>}, {transform_indices = @transform_2, window_bounds = array<i64: 4, 4>}, {transform_indices = @transform_3, window_bounds = array<i64: 4, 1024>}]} {
    %c0 = arith.constant 0 : index
    %c0_0 = arith.constant 0 : index
    %0 = vector.load %arg1[%c0, %c0_0] : memref<4x1024xf32, #tpu.memory_space<vmem>>, vector<4x1024xf32>
    %cst = arith.constant dense<0.000000e+00> : vector<4xf32>
    %1 = vector.multi_reduction <add>, %0, %cst [1] : vector<4x1024xf32> to vector<4xf32>
    %2 = vector.shape_cast %1 : vector<4xf32> to vector<4x1xf32>
    %cst_1 = arith.constant 9.765625E-4 : f32
    %3 = vector.broadcast %cst_1 : f32 to vector<4x1xf32>
    %4 = arith.mulf %2, %3 : vector<4x1xf32>
    %c0_2 = arith.constant 0 : index
    %c0_3 = arith.constant 0 : index
    %5 = vector.load %arg1[%c0_2, %c0_3] : memref<4x1024xf32, #tpu.memory_space<vmem>>, vector<4x1024xf32>
    %6 = vector.broadcast %4 : vector<4x1xf32> to vector<4x1024xf32>
    %7 = arith.subf %5, %6 : vector<4x1024xf32>
    %8 = arith.mulf %7, %7 : vector<4x1024xf32>
    %cst_4 = arith.constant dense<0.000000e+00> : vector<4xf32>
    %9 = vector.multi_reduction <add>, %8, %cst_4 [1] : vector<4x1024xf32> to vector<4xf32>
    %10 = vector.shape_cast %9 : vector<4xf32> to vector<4x1xf32>
    %cst_5 = arith.constant 9.765625E-4 : f32
    %11 = vector.broadcast %cst_5 : f32 to vector<4x1xf32>
    %12 = arith.mulf %10, %11 : vector<4x1xf32>
    %cst_6 = arith.constant 9.99999974E-6 : f32
    %13 = vector.broadcast %cst_6 : f32 to vector<4x1xf32>
    %14 = arith.addf %12, %13 : vector<4x1xf32>
    %15 = math.rsqrt %14 : vector<4x1xf32>
    %c0_7 = arith.constant 0 : index
    %c0_8 = arith.constant 0 : index
    %16 = vector.load %arg2[%c0_7, %c0_8] : memref<4x4xf32, #tpu.memory_space<vmem>>, vector<4x4xf32>
    %c0_9 = arith.constant 0 : index
    %c0_10 = arith.constant 0 : index
    %17 = vector.load %arg3[%c0_9, %c0_10] : memref<4x4xf32, #tpu.memory_space<vmem>>, vector<4x4xf32>
    %18 = vector.broadcast %15 : vector<4x1xf32> to vector<4x4xf32>
    %19 = arith.mulf %16, %18 : vector<4x4xf32>
    %20 = vector.broadcast %4 : vector<4x1xf32> to vector<4x4xf32>
    %21 = arith.mulf %20, %19 : vector<4x4xf32>
    %22 = arith.subf %17, %21 : vector<4x4xf32>
    %c0_11 = arith.constant 0 : index
    %c0_12 = arith.constant 0 : index
    %23 = vector.load %arg1[%c0_11, %c0_12] : memref<4x1024xf32, #tpu.memory_space<vmem>>, vector<4x256xf32>
    %24 = vector.extract_strided_slice %19 {offsets = [0, 0], sizes = [4, 1], strides = [1, 1]} : vector<4x4xf32> to vector<4x1xf32>
    %25 = vector.broadcast %24 : vector<4x1xf32> to vector<4x256xf32>
    %26 = arith.mulf %23, %25 : vector<4x256xf32>
    %27 = vector.extract_strided_slice %22 {offsets = [0, 0], sizes = [4, 1], strides = [1, 1]} : vector<4x4xf32> to vector<4x1xf32>
    %28 = vector.broadcast %27 : vector<4x1xf32> to vector<4x256xf32>
    %29 = arith.addf %26, %28 : vector<4x256xf32>
    %c0_13 = arith.constant 0 : index
    %c0_14 = arith.constant 0 : index
    %30 = vector.load %arg4[%c0_13, %c0_14] : memref<4x1024xf32, #tpu.memory_space<vmem>>, vector<4x256xf32>
    tpu.vector_store %arg4[%c0_13, %c0_14], %29 {strides = array<i32>} : memref<4x1024xf32, #tpu.memory_space<vmem>>, vector<4x256xf32>,
    %c0_15 = arith.constant 0 : index
    %c256 = arith.constant 256 : index
    %31 = vector.load %arg1[%c0_15, %c256] : memref<4x1024xf32, #tpu.memory_space<vmem>>, vector<4x256xf32>
    %32 = vector.extract_strided_slice %19 {offsets = [0, 1], sizes = [4, 1], strides = [1, 1]} : vector<4x4xf32> to vector<4x1xf32>
    %33 = vector.broadcast %32 : vector<4x1xf32> to vector<4x256xf32>
    %34 = arith.mulf %31, %33 : vector<4x256xf32>
    %35 = vector.extract_strided_slice %22 {offsets = [0, 1], sizes = [4, 1], strides = [1, 1]} : vector<4x4xf32> to vector<4x1xf32>
    %36 = vector.broadcast %35 : vector<4x1xf32> to vector<4x256xf32>
    %37 = arith.addf %34, %36 : vector<4x256xf32>
    %c0_16 = arith.constant 0 : index
    %c256_17 = arith.constant 256 : index
    %38 = vector.load %arg4[%c0_16, %c256_17] : memref<4x1024xf32, #tpu.memory_space<vmem>>, vector<4x256xf32>
    tpu.vector_store %arg4[%c0_16, %c256_17], %37 {strides = array<i32>} : memref<4x1024xf32, #tpu.memory_space<vmem>>, vector<4x256xf32>,
    %c0_18 = arith.constant 0 : index
    %c512 = arith.constant 512 : index
    %39 = vector.load %arg1[%c0_18, %c512] : memref<4x1024xf32, #tpu.memory_space<vmem>>, vector<4x256xf32>
    %40 = vector.extract_strided_slice %19 {offsets = [0, 2], sizes = [4, 1], strides = [1, 1]} : vector<4x4xf32> to vector<4x1xf32>
    %41 = vector.broadcast %40 : vector<4x1xf32> to vector<4x256xf32>
    %42 = arith.mulf %39, %41 : vector<4x256xf32>
    %43 = vector.extract_strided_slice %22 {offsets = [0, 2], sizes = [4, 1], strides = [1, 1]} : vector<4x4xf32> to vector<4x1xf32>
    %44 = vector.broadcast %43 : vector<4x1xf32> to vector<4x256xf32>
    %45 = arith.addf %42, %44 : vector<4x256xf32>
    %c0_19 = arith.constant 0 : index
    %c512_20 = arith.constant 512 : index
    %46 = vector.load %arg4[%c0_19, %c512_20] : memref<4x1024xf32, #tpu.memory_space<vmem>>, vector<4x256xf32>
    tpu.vector_store %arg4[%c0_19, %c512_20], %45 {strides = array<i32>} : memref<4x1024xf32, #tpu.memory_space<vmem>>, vector<4x256xf32>,
    %c0_21 = arith.constant 0 : index
    %c768 = arith.constant 768 : index
    %47 = vector.load %arg1[%c0_21, %c768] : memref<4x1024xf32, #tpu.memory_space<vmem>>, vector<4x256xf32>
    %48 = vector.extract_strided_slice %19 {offsets = [0, 3], sizes = [4, 1], strides = [1, 1]} : vector<4x4xf32> to vector<4x1xf32>
    %49 = vector.broadcast %48 : vector<4x1xf32> to vector<4x256xf32>
    %50 = arith.mulf %47, %49 : vector<4x256xf32>
    %51 = vector.extract_strided_slice %22 {offsets = [0, 3], sizes = [4, 1], strides = [1, 1]} : vector<4x4xf32> to vector<4x1xf32>
    %52 = vector.broadcast %51 : vector<4x1xf32> to vector<4x256xf32>
    %53 = arith.addf %50, %52 : vector<4x256xf32>
    %c0_22 = arith.constant 0 : index
    %c768_23 = arith.constant 768 : index
    %54 = vector.load %arg4[%c0_22, %c768_23] : memref<4x1024xf32, #tpu.memory_space<vmem>>, vector<4x256xf32>
    tpu.vector_store %arg4[%c0_22, %c768_23], %53 {strides = array<i32>} : memref<4x1024xf32, #tpu.memory_space<vmem>>, vector<4x256xf32>,
    return
  }
  func.func @transform_0(%arg0: i32) -> (i32, i32) {
    %c0_i32 = arith.constant 0 : i32
    %c0_i32_0 = arith.constant 0 : i32
    return %arg0, %c0_i32 : i32, i32
  }
  func.func @transform_1(%arg0: i32) -> (i32, i32) {
    %c0_i32 = arith.constant 0 : i32
    %c0_i32_0 = arith.constant 0 : i32
    return %arg0, %c0_i32 : i32, i32
  }
  func.func @transform_2(%arg0: i32) -> (i32, i32) {
    %c0_i32 = arith.constant 0 : i32
    %c0_i32_0 = arith.constant 0 : i32
    return %arg0, %c0_i32 : i32, i32
  }
  func.func @transform_3(%arg0: i32) -> (i32, i32) {
    %c0_i32 = arith.constant 0 : i32
    %c0_i32_0 = arith.constant 0 : i32
    return %arg0, %c0_i32 : i32, i32
  }
}

</mosaic_0001>

<bundles_post_ra>
// kernel: tpu_custom_call.1
= control target key start
LH: loop header
LB: loop body
LE: loop exit
PB: predicated region body
PF: predicated region fallthrough
CT: control target
= control target key end

     0   :  { %8 = vsyncpa [#allocation3], 0  ;;  %s490_s0 = inlined_call_operand.hbm [shape: f32[4,1024], index: 0, kind: input, shape index: {}]   ;;  %s491_s1 = inlined_call_operand.hbm [shape: f32[4,4], index: 1, kind: input, shape index: {}]   ;;  %s492_s2 = inlined_call_operand.hbm [shape: f32[4,4], index: 2, kind: input, shape index: {}]   ;;  %s493_s3 = inlined_call_operand.hbm [shape: f32[4,1024], index: 3, kind: output, shape index: {}]  }
   0x1   :  { %9 = vsyncpa [#allocation6], 0  ;;  %s27_s14 = sshll.u32 %s491_s1, 4  ;;  %s28_s14 = int_to_ptr.hbm [resolvable:$true] %s27_s14 }
   0x2   :  { %10 = vsyncpa [#allocation4], 0  ;;  %s402_s15 = smov [#allocation5]   ;;  %s16_s19 = sshll.u32 %s490_s0, 4  ;;  %s17_s19 = int_to_ptr.hbm [resolvable:$true] %s16_s19 }
   0x3   :  { %s29_s16 = sshll.u32 %s402_s15, 4  ;;  %s403_s20 = smov [#allocation2]   ;;  %s30_s16 = int_to_ptr.vmem [resolvable:$true] %s29_s16 }
   0x4   :  { %32 = dma.hbm_to_vmem [thread:$0]  %s28_s14, 64, %s30_s16, [#allocation6]  }
   0x5   :  { %s18_s21 = sshll.u32 %s403_s20, 4  ;;  %s38_s24 = sshll.u32 %s492_s2, 4  ;;  %s19_s21 = int_to_ptr.vmem [resolvable:$true] %s18_s21  ;;  %s39_s24 = int_to_ptr.hbm [resolvable:$true] %s38_s24 }
   0x6   :  { %21 = dma.hbm_to_vmem [thread:$0]  %s17_s19, 512, %s19_s21, [#allocation3]  }
   0x7   :  { %s404_s1 = smov [#allocation7]  }
   0x8   :  { %s40_s25 = sshll.u32 %s404_s1, 4  ;;  %s41_s25 = int_to_ptr.vmem [resolvable:$true] %s40_s25 }
   0x9   :  { %43 = dma.hbm_to_vmem [thread:$0]  %s39_s24, 64, %s41_s25, [#allocation6]  }
   0xa   :  { %396 = dma.done.wait [#allocation3], 512  }
   0xb   :  { %397 = vsyncadd [#allocation3], 4294966784 }
   0xc   :  { %398 = dma.done.wait [#allocation6], 128  }
   0xd   :  { %399 = vsyncadd [#allocation6], 4294967168  ;;  %v440_v0 = vld [vmem:[#allocation2] sm:$0xff]  ;;  %v442_v1 = vld [vmem:[#allocation2 + $0x8] sm:$0xff]  ;;  %vm87_vm0 = vcmask 1043456   ;;  %s410_s0 = smov [#allocation8]  }
   0xe   :  { %v444_v2 = vld [vmem:[#allocation2 + $0x10] sm:$0xff]  ;;  %v446_v3 = vld [vmem:[#allocation2 + $0x18] sm:$0xff]  ;;  %64 = vst [vmem:[#allocation1] ss:$2 sm:$0xff] %v440_v0  ;;  %v405_v27 = vmov 839922192  }
   0xf   :  { %66 = vst [vmem:[#allocation1 + $0x10] ss:$2 sm:$0xff] %v442_v1  ;;  %v108_v28 = vunpack.c.l.s4 %v405_v27  ;;  %s268_s2 = sshll.u32 %s410_s0, 4  ;;  %s270_s28 = sshll.u32 %s493_s3, 4  ;;  %s269_s2 = int_to_ptr.vmem [resolvable:$true] %s268_s2  ;;  %s271_s28 = int_to_ptr.hbm [resolvable:$true] %s270_s28 }
  0x10   :  { %68 = vst [vmem:[#allocation1 + $0x20] ss:$2 sm:$0xff] %v444_v2 }
  0x11   :  { %70 = vst [vmem:[#allocation1 + $0x30] ss:$2 sm:$0xff] %v446_v3  ;;  %v460_v29 = vunpack.c.0.s8 %v108_v28 }
  0x15   :  { %v71_v4 = vld.sshfl [vmem:[#allocation1] sm:$0xff pattern:$0x75316420]  ;;  %v72_v5 = vld.sshfl [vmem:[#allocation1 + $0x8] sm:$0xff pattern:$0x75316420] }
  0x16   :  { %v73_v6 = vld.sshfl [vmem:[#allocation1 + $0x10] sm:$0xff pattern:$0x75316420]  ;;  %v74_v7 = vld.sshfl [vmem:[#allocation1 + $0x18] sm:$0xff pattern:$0x75316420] }
  0x17   :  { %v88_v8 = vsel %vm87_vm0, %v71_v4, 0.0  ;;  %v89_v9 = vsel %vm87_vm0, %v72_v5, 0.0  ;;  %v91_v10 = vsel %vm87_vm0, %v73_v6, 0.0  ;;  %v75_v11 = vld.sshfl [vmem:[#allocation1 + $0x20] sm:$0xff pattern:$0x75316420] }
  0x18   :  { %v90_v12 = vadd.f32 %v89_v9, %v88_v8  ;;  %v93_v13 = vsel %vm87_vm0, %v74_v7, 0.0  ;;  %v76_v14 = vld.sshfl [vmem:[#allocation1 + $0x28] sm:$0xff pattern:$0x75316420]  ;;  %v95_v16 = vsel %vm87_vm0, %v75_v11, 0.0  ;;  %v406_v4 = vmov 2  }
  0x19   :  { %v77_v17 = vld.sshfl [vmem:[#allocation1 + $0x30] sm:$0xff pattern:$0x75316420]  ;;  %v97_v19 = vsel %vm87_vm0, %v76_v14, 0.0  ;;  %292 = vset.pattern.permute.xlu2 %v406_v4  ;;  %v407_v5 = vmov 0  }
  0x1a   :  { %v92_v15 = vadd.f32 %v91_v10, %v90_v12  ;;  %v78_v20 = vld.sshfl [vmem:[#allocation1 + $0x38] sm:$0xff pattern:$0x75316420]  ;;  %v99_v22 = vsel %vm87_vm0, %v77_v17, 0.0  ;;  %290 = vset.pattern.permute.xlu1 %v407_v5  ;;  %294 = vset.pattern.permute.xlu0 %v407_v5  ;;  %v176_v14 = vld [vmem:[#allocation5] sm:$0xf] }
  0x1b   :  { %v101_v24 = vsel %vm87_vm0, %v78_v20, 0.0 }
  0x1c   :  { %v94_v18 = vadd.f32 %v93_v13, %v92_v15 }
  0x1e   :  { %v96_v21 = vadd.f32 %v95_v16, %v94_v18  ;;  %v177_v18 = vld [vmem:[#allocation7] sm:$0xf] }
  0x20   :  { %v98_v23 = vadd.f32 %v97_v19, %v96_v21  ;;  %v408_v21 = vmov 3  }
  0x22   :  { %v100_v25 = vadd.f32 %v99_v22, %v98_v23  ;;  %v409_v22 = vmov 1  }
  0x24   :  { %v102_v26 = vadd.f32 %v101_v24, %v100_v25 }
  0x26   :  { %103 = vadd.xlane.f32.xlu0 %v102_v26 }
  0x99   :  { %v104_v30 = vpop.xlane.xlu0 %103 }
  0x9a   :  { %v105_v31 = vmul.f32 0.0009765625, %v104_v30 }
  0x9c   :  { %v110_v32 = vperm.slane %v105_v31, %v460_v29 }
  0x9e   :  { %v112_v33 = vsub.f32 %v440_v0, %v110_v32  ;;  %v113_v34 = vsub.f32 %v442_v1, %v110_v32  ;;  %v114_v35 = vsub.f32 %v444_v2, %v110_v32  ;;  %v115_v36 = vsub.f32 %v446_v3, %v110_v32 }
  0xa0   :  { %v116_v37 = vmul.f32 %v112_v33, %v112_v33  ;;  %v117_v38 = vmul.f32 %v113_v34, %v113_v34  ;;  %v118_v39 = vmul.f32 %v114_v35, %v114_v35  ;;  %v119_v40 = vmul.f32 %v115_v36, %v115_v36 }
  0xa2   :  { %124 = vst [vmem:[#allocation1] ss:$2 sm:$0xff] %v116_v37 }
  0xa3   :  { %126 = vst [vmem:[#allocation1 + $0x10] ss:$2 sm:$0xff] %v117_v38 }
  0xa4   :  { %128 = vst [vmem:[#allocation1 + $0x20] ss:$2 sm:$0xff] %v118_v39 }
  0xa5   :  { %130 = vst [vmem:[#allocation1 + $0x30] ss:$2 sm:$0xff] %v119_v40 }
  0xa9   :  { %v131_v41 = vld.sshfl [vmem:[#allocation1] sm:$0xff pattern:$0x75316420]  ;;  %v132_v42 = vld.sshfl [vmem:[#allocation1 + $0x8] sm:$0xff pattern:$0x75316420] }
  0xaa   :  { %v133_v43 = vld.sshfl [vmem:[#allocation1 + $0x10] sm:$0xff pattern:$0x75316420]  ;;  %v147_v44 = vsel %vm87_vm0, %v131_v41, 0.0  ;;  %v148_v45 = vsel %vm87_vm0, %v132_v42, 0.0 }
  0xab   :  { %v134_v46 = vld.sshfl [vmem:[#allocation1 + $0x18] sm:$0xff pattern:$0x75316420]  ;;  %v149_v47 = vadd.f32 %v148_v45, %v147_v44  ;;  %v150_v48 = vsel %vm87_vm0, %v133_v43, 0.0 }
  0xac   :  { %v135_v49 = vld.sshfl [vmem:[#allocation1 + $0x20] sm:$0xff pattern:$0x75316420]  ;;  %v152_v51 = vsel %vm87_vm0, %v134_v46, 0.0 }
  0xad   :  { %v151_v50 = vadd.f32 %v150_v48, %v149_v47  ;;  %v136_v52 = vld.sshfl [vmem:[#allocation1 + $0x28] sm:$0xff pattern:$0x75316420]  ;;  %v154_v54 = vsel %vm87_vm0, %v135_v49, 0.0 }
  0xae   :  { %v137_v55 = vld.sshfl [vmem:[#allocation1 + $0x30] sm:$0xff pattern:$0x75316420]  ;;  %v156_v57 = vsel %vm87_vm0, %v136_v52, 0.0 }
  0xaf   :  { %v153_v53 = vadd.f32 %v152_v51, %v151_v50  ;;  %v138_v58 = vld.sshfl [vmem:[#allocation1 + $0x38] sm:$0xff pattern:$0x75316420]  ;;  %v158_v60 = vsel %vm87_vm0, %v137_v55, 0.0 }
  0xb0   :  { %v160_v62 = vsel %vm87_vm0, %v138_v58, 0.0 }
  0xb1   :  { %v155_v56 = vadd.f32 %v154_v54, %v153_v53 }
  0xb3   :  { %v157_v59 = vadd.f32 %v156_v57, %v155_v56 }
  0xb5   :  { %v159_v61 = vadd.f32 %v158_v60, %v157_v59 }
  0xb7   :  { %v161_v63 = vadd.f32 %v160_v62, %v159_v61 }
  0xb9   :  { %162 = vadd.xlane.f32.xlu0 %v161_v63 }
 0x12c   :  { %v163_v6 = vpop.xlane.xlu0 %162 }
 0x12d   :  { %v164_v7 = vmul.f32 0.0009765625, %v163_v6 }
 0x12f   :  { %v165_v8 = vadd.f32 1e-05, %v164_v7 }
 0x131   :  { %298 = vrsqrt.f32 %v165_v8  ;;  %vm172_vm2 = vweird.f32 %v165_v8 }
 0x137   :  { %v299_v9 = vpop.eup %298 }
 0x138   :  { %v167_v10 = vmul.f32 %v299_v9, %v165_v8  ;;  %vm173_vm1 = vweird.f32 %v299_v9 }
 0x139   :  { %vm174_vm3 = vmor %vm172_vm2, %vm173_vm1 }
 0x13a   :  { %v168_v11 = vmul.f32 %v299_v9, %v167_v10 }
 0x13c   :  { %v169_v12 = vmul.f32 0.5, %v168_v11 }
 0x13e   :  { %v170_v13 = vsub.f32 1.5, %v169_v12 }
 0x140   :  { %v171_v15 = vmul.f32 %v299_v9, %v170_v13 }
 0x142   :  { %v175_v16 = vsel %vm174_vm3, %v299_v9, %v171_v15 }
 0x143   :  { %v178_v17 = vmul.f32 %v176_v14, %v175_v16 }
 0x145   :  { %225 = vperm.xlu2 %292, %v178_v17   ;;  %184 = vperm.xlu1 %290, %v178_v17   ;;  %v179_v19 = vmul.f32 %v178_v17, %v105_v31 }
 0x147   :  { %v180_v20 = vsub.f32 %v177_v18, %v179_v19 }
 0x149   :  { %194 = vperm.xlu0 %294, %v180_v20  }
 0x14d   :  { %293 = vset.pattern.permute.xlu2 %v408_v21  ;;  %291 = vset.pattern.permute.xlu1 %v409_v22 }
 0x14e   :  { %245 = vperm.xlu2 %293, %v178_v17   ;;  %205 = vperm.xlu1 %291, %v178_v17  }
 0x151   :  { %297 = vset.pattern.permute.xlu0 %v408_v21 }
 0x156   :  { %295 = vset.pattern.permute.xlu2 %v406_v4  ;;  %214 = vperm.xlu1 %291, %v180_v20  }
 0x157   :  { %234 = vperm.xlu2 %295, %v180_v20  }
 0x15e   :  { %296 = vset.pattern.permute.xlu1 %v408_v21 }
 0x15f   :  { %254 = vperm.xlu1 %296, %v180_v20  }
 0x19f   :  { %v226_v23 = vpop.permute.xlu2 %225 }
 0x1a0   :  { %v230_v25 = vperm.slane %v226_v23, %v460_v29 }
 0x1a2   :  { %v232_v27 = vmul.f32 %v230_v25, %v444_v2 }
 0x1a8   :  { %v246_v24 = vpop.permute.xlu2 %245 }
 0x1a9   :  { %v250_v42 = vperm.slane %v246_v24, %v460_v29 }
 0x1b1   :  { %v235_v26 = vpop.permute.xlu2 %234 }
 0x1b2   :  { %v239_v28 = vperm.slane %v235_v26, %v460_v29 }
 0x1b4   :  { %v241_v30 = vadd.f32 %v239_v28, %v232_v27 }
 0x1b6   :  { %242 = vst [vmem:[#allocation8 + $0x10] sm:$0xff] %v241_v30 }
 0x1b7   :  { %v185_v31 = vpop.permute.xlu1 %184 }
 0x1b8   :  { %v189_v32 = vperm.slane %v185_v31, %v460_v29 }
 0x1ba   :  { %v191_v34 = vmul.f32 %v189_v32, %v440_v0  ;;  %v252_v0 = vmul.f32 %v250_v42, %v446_v3 }
 0x1bb   :  { %v195_v33 = vpop.permute.xlu0 %194 }
 0x1bc   :  { %v199_v35 = vperm.slane %v195_v33, %v460_v29 }
 0x1be   :  { %v201_v36 = vadd.f32 %v199_v35, %v191_v34 }
 0x1c0   :  { %202 = vst [vmem:[#allocation8] sm:$0xff] %v201_v36  ;;  %v206_v37 = vpop.permute.xlu1 %205 }
 0x1c1   :  { %v210_v38 = vperm.slane %v206_v37, %v460_v29 }
 0x1c3   :  { %v212_v2 = vmul.f32 %v210_v38, %v442_v1 }
 0x1c8   :  { %v215_v39 = vpop.permute.xlu1 %214 }
 0x1c9   :  { %v219_v40 = vperm.slane %v215_v39, %v460_v29 }
 0x1cb   :  { %v221_v41 = vadd.f32 %v219_v40, %v212_v2 }
 0x1cd   :  { %222 = vst [vmem:[#allocation8 + $0x8] sm:$0xff] %v221_v41 }
 0x1d1   :  { %v255_v43 = vpop.permute.xlu1 %254 }
 0x1d2   :  { %v259_v44 = vperm.slane %v255_v43, %v460_v29 }
 0x1d4   :  { %v261_v45 = vadd.f32 %v259_v44, %v252_v0 }
 0x1d6   :  { %262 = vst [vmem:[#allocation8 + $0x18] sm:$0xff] %v261_v45 }
 0x1d7   :  { %273 = dma.vmem_to_hbm [thread:$0]  %s269_s2, 512, %s271_s28, [#allocation4]  }
 0x1d8   :  { %400 = dma.done.wait [#allocation4], 512  }
 0x1d9   :  { %401 = vsyncadd [#allocation4], 4294966784 }
 0x1da   :  { %278 = vsyncpa [#allocation3], 1 }
 0x1db   :  { %279 = vsyncpa [#allocation6], 1 }
 0x1dc   :  { %280 = vsyncpa [#allocation4], 1 }

</bundles_post_ra>
